<compile_context>
chip_gen: v7x
topology: tpu7x:2x2x1
jax: 0.10.0
libtpu: 0.0.40
codegen_flags: <defaults>
</compile_context>

<pallas_src>
import jax
import jax.numpy as jnp
from jax.experimental import pallas as pl
from jax.experimental.pallas import tpu as pltpu


def _round_up(x, m):
    return ((x + m - 1) // m) * m


def _pick_tm(n, f, c_pad, budget_bytes=16 * 1024 * 1024):
    """Batch tile size: double-buffered (TM,F) input + (TM,C_pad) output, f32,
    kept under a conservative budget so it fits every TPU generation's scoped
    VMEM (incl. v7x's 64 MiB physical / 32 MiB default)."""
    tm = 512
    while tm > 8 and (2 * tm * f + 2 * tm * c_pad) * 4 > budget_bytes:
        tm //= 2
    tm = min(tm, _round_up(n, 8))
    return max(tm, 8)


def _classifier_kernel(inv_sigma_ref, x_ref, w_ref, b_ref, o_ref):
    # inv_sigma_ref: (1,) scalar in SMEM (scalar prefetch)
    # x_ref: (TM, F)   w_ref: (F, C_pad)   b_ref: (1, C_pad)   o_ref: (TM, C_pad)
    acc = jnp.dot(x_ref[...], w_ref[...], preferred_element_type=jnp.float32)
    o_ref[...] = acc * inv_sigma_ref[0] + b_ref[...]


def classifier_forward(seq, weight, bias, u):
    """Forward pass of spectral_norm(Linear)(seq).

    seq:    (N, ft_in) float32
    weight: (nb_classes, ft_in) float32  (un-normalized Linear weight)
    bias:   (nb_classes,) float32
    u:      (nb_classes,) float32  (power-iteration left vector, normalized)
    """
    N, F = seq.shape
    C, _ = weight.shape

    # --- spectral norm power iteration (glue, tiny vectors) -----------------
    eps = 1e-12
    w32 = weight.astype(jnp.float32)
    v = w32.T @ u
    v = v / jnp.maximum(jnp.linalg.norm(v), eps)
    u_new = w32 @ v
    u_new = u_new / jnp.maximum(jnp.linalg.norm(u_new), eps)
    sigma = u_new @ (w32 @ v)                     # scalar
    sigma = jnp.maximum(sigma, eps)               # guard against zero-rank W
    inv_sigma = (1.0 / sigma).reshape(1).astype(jnp.float32)

    # --- layout prep: lane-dense output, pre-transposed weight ---------------
    C_pad = _round_up(C, 128)
    w_t = jnp.pad(w32.T, ((0, 0), (0, C_pad - C)))                 # (F, C_pad)
    b_pad = jnp.pad(bias.astype(jnp.float32), (0, C_pad - C)).reshape(1, C_pad)

    TM = _pick_tm(N, F, C_pad)
    N_pad = _round_up(N, TM)
    x = seq.astype(jnp.float32)
    if N_pad != N:
        x = jnp.pad(x, ((0, N_pad - N), (0, 0)))

    grid = (N_pad // TM,)

    out = pl.pallas_call(
        _classifier_kernel,
        out_shape=jax.ShapeDtypeStruct((N_pad, C_pad), jnp.float32),
        grid_spec=pltpu.PrefetchScalarGridSpec(
            num_scalar_prefetch=1,                 # inv_sigma -> SMEM
            grid=grid,
            in_specs=[
                pl.BlockSpec((TM, F), lambda i, s: (i, 0)),        # seq tile
                pl.BlockSpec((F, C_pad), lambda i, s: (0, 0)),     # weight (resident)
                pl.BlockSpec((1, C_pad), lambda i, s: (0, 0)),     # bias (resident)
            ],
            out_specs=pl.BlockSpec((TM, C_pad), lambda i, s: (i, 0)),
        ),
        compiler_params=pltpu.CompilerParams(
            dimension_semantics=("parallel",),
            vmem_limit_bytes=48 * 1024 * 1024,
        ),
        cost_estimate=pl.CostEstimate(
            flops=2 * N_pad * F * C_pad,
            transcendentals=0,
            bytes_accessed=4 * (N_pad * F + F * C_pad + N_pad * C_pad),
        ),
    )(inv_sigma, x, w_t, b_pad)

    # NOTE: PyTorch's spectral_norm also updates the stored `u` buffer in
    # training mode; return only the output to match Classifier.forward.
    return out[:N, :C]


if __name__ == "__main__":
    key = jax.random.PRNGKey(0)
    k_x, k_w, k_b, k_u = jax.random.split(key, 4)

    batch = 16
    ft_in = 32
    nb_classes = 8

    # deterministic synthetic parameters (shapes from nn.Linear(ft_in, nb_classes))
    seq = jax.random.normal(k_x, (batch, ft_in), dtype=jnp.float32)
    bound = 1.0 / jnp.sqrt(ft_in)
    weight = jax.random.uniform(
        k_w, (nb_classes, ft_in), minval=-bound, maxval=bound, dtype=jnp.float32
    )
    bias = jax.random.uniform(
        k_b, (nb_classes,), minval=-bound, maxval=bound, dtype=jnp.float32
    )
    u0 = jax.random.normal(k_u, (nb_classes,), dtype=jnp.float32)
    u0 = u0 / jnp.maximum(jnp.linalg.norm(u0), 1e-12)

    out = classifier_forward(seq, weight, bias, u0)
    out = jax.block_until_ready(out)

    # reference check in plain JAX (same math)
    eps = 1e-12
    v = weight.T @ u0
    v = v / jnp.maximum(jnp.linalg.norm(v), eps)
    u1 = weight @ v
    u1 = u1 / jnp.maximum(jnp.linalg.norm(u1), eps)
    sigma = u1 @ (weight @ v)
    ref = seq @ (weight / sigma).T + bias

    assert out.shape == (batch, nb_classes)
    assert jnp.allclose(out, ref, atol=1e-5, rtol=1e-5), "mismatch vs reference"

    print("KERNEL_OK")
</pallas_src>

<mosaic_0001>
module attributes {stable_mosaic.version = 11 : i64} {
  func.func @_classifier_kernel(%arg0: i32, %arg1: memref<1xf32, #tpu.memory_space<smem>>, %arg2: memref<16x32xf32, #tpu.memory_space<vmem>>, %arg3: memref<32x128xf32, #tpu.memory_space<vmem>>, %arg4: memref<1x128xf32, #tpu.memory_space<vmem>>, %arg5: memref<16x128xf32, #tpu.memory_space<vmem>>) attributes {dimension_semantics = [#tpu.dimension_semantics<parallel>], iteration_bounds = array<i64: 1>, scalar_prefetch = 1 : i64, scratch_operands = 0 : i64, tpu.core_type = #tpu.core_type<tc>, window_params = [{transform_indices = @transform_0, window_bounds = array<i64: 16, 32>}, {pipeline_mode = #tpu.pipeline_mode<synchronous>, transform_indices = @transform_1, window_bounds = array<i64: 32, 128>}, {pipeline_mode = #tpu.pipeline_mode<synchronous>, transform_indices = @transform_2, window_bounds = array<i64: 1, 128>}, {transform_indices = @transform_3, window_bounds = array<i64: 16, 128>}]} {
    %c0 = arith.constant 0 : index
    %c0_0 = arith.constant 0 : index
    %0 = vector.load %arg2[%c0, %c0_0] : memref<16x32xf32, #tpu.memory_space<vmem>>, vector<16x32xf32>
    %c0_1 = arith.constant 0 : index
    %c0_2 = arith.constant 0 : index
    %1 = vector.load %arg3[%c0_1, %c0_2] : memref<32x128xf32, #tpu.memory_space<vmem>>, vector<32x128xf32>
    %cst = arith.constant dense<0.000000e+00> : vector<16x128xf32>
    %2 = tpu.matmul %0, %1, %cst {dimension_numbers = #tpu.dot_dimension_numbers<[1], [0], [0], [1], [0, 0, 1, 1], [], []>} : vector<16x32xf32>, vector<32x128xf32>, vector<16x128xf32> -> vector<16x128xf32>
    %c0_3 = arith.constant 0 : index
    %3 = memref.load %arg1[%c0_3] : memref<1xf32, #tpu.memory_space<smem>>
    %4 = vector.broadcast %3 : f32 to vector<16x128xf32>
    %5 = arith.mulf %2, %4 : vector<16x128xf32>
    %c0_4 = arith.constant 0 : index
    %c0_5 = arith.constant 0 : index
    %6 = vector.load %arg4[%c0_4, %c0_5] : memref<1x128xf32, #tpu.memory_space<vmem>>, vector<1x128xf32>
    %7 = vector.broadcast %6 : vector<1x128xf32> to vector<16x128xf32>
    %8 = arith.addf %5, %7 : vector<16x128xf32>
    %c0_6 = arith.constant 0 : index
    %c0_7 = arith.constant 0 : index
    %9 = vector.load %arg5[%c0_6, %c0_7] : memref<16x128xf32, #tpu.memory_space<vmem>>, vector<16x128xf32>
    tpu.vector_store %arg5[%c0_6, %c0_7], %8 {strides = array<i32>} : memref<16x128xf32, #tpu.memory_space<vmem>>, vector<16x128xf32>,
    return
  }
  func.func @transform_0(%arg0: i32, %arg1: memref<1xf32, #tpu.memory_space<smem>>) -> (i32, i32) {
    %c0_i32 = arith.constant 0 : i32
    %c0_i32_0 = arith.constant 0 : i32
    return %arg0, %c0_i32 : i32, i32
  }
  func.func @transform_1(%arg0: i32, %arg1: memref<1xf32, #tpu.memory_space<smem>>) -> (i32, i32) {
    %c0_i32 = arith.constant 0 : i32
    %c0_i32_0 = arith.constant 0 : i32
    %c0_i32_1 = arith.constant 0 : i32
    return %c0_i32, %c0_i32_0 : i32, i32
  }
  func.func @transform_2(%arg0: i32, %arg1: memref<1xf32, #tpu.memory_space<smem>>) -> (i32, i32) {
    %c0_i32 = arith.constant 0 : i32
    %c0_i32_0 = arith.constant 0 : i32
    %c0_i32_1 = arith.constant 0 : i32
    return %c0_i32, %c0_i32_0 : i32, i32
  }
  func.func @transform_3(%arg0: i32, %arg1: memref<1xf32, #tpu.memory_space<smem>>) -> (i32, i32) {
    %c0_i32 = arith.constant 0 : i32
    %c0_i32_0 = arith.constant 0 : i32
    return %arg0, %c0_i32 : i32, i32
  }
}

</mosaic_0001>

<bundles_post_ra>
// kernel: tpu_custom_call.1
= control target key start
LH: loop header
LB: loop body
LE: loop exit
PB: predicated region body
PF: predicated region fallthrough
CT: control target
= control target key end

     0   :  { %10 = vsyncpa [#allocation5], 0  ;;  %s352_s0 = inlined_call_operand.<no memory space> [shape: f32[1], index: 0, kind: input, shape index: {}]   ;;  %s353_s1 = inlined_call_operand.hbm [shape: f32[16,32], index: 1, kind: input, shape index: {}]   ;;  %s354_s2 = inlined_call_operand.hbm [shape: f32[32,128], index: 2, kind: input, shape index: {}]   ;;  %s355_s3 = inlined_call_operand.vmem [shape: f32[1,128], index: 3, kind: input, shape index: {}]   ;;  %s356_s4 = inlined_call_operand.hbm [shape: f32[16,128], index: 4, kind: output, shape index: {}]  }
   0x1   :  { %11 = vsyncpa [#allocation8], 0 }
   0x2   :  { %12 = vsyncpa [#allocation6], 0  ;;  %s271_s15 = smov [#allocation4]   ;;  %s199_s19 = scalar_lea.hbm %s353_s1, 256 }
   0x3   :  { %s18_s16 = sshll.u32 %s271_s15, 4  ;;  %p200_p0 = scmp.ne.s32.totalorder %s353_s1, %s199_s19  ;;  %s19_s16 = int_to_ptr.vmem [resolvable:$true] %s18_s16 }
   0x4   :  { %p203_p1 = scmp.lt.u32.totalorder %s199_s19, %s353_s1 }
   0x6   :  { %p205_p2 = pnand %p203_p1, %p200_p0 }
   0x8   :  { %208 = shalt.err (!%p205_p2)
}
   0x9   :  { %s209_s24 = scalar_lea.vmem %s19_s16, 256  ;;  %p214_p4 = scmp.lt.s32.totalorder %s19_s16, %s19_s16 }
   0xa   :  { %p210_p3 = scmp.ne.s32.totalorder %s19_s16, %s209_s24  ;;  %p215_p5 = scmp.lt.s32.totalorder %s209_s24, %s209_s24 }
   0xc   :  { %p216_p6 = por %p215_p5, %p214_p4 }
   0xe   :  { %p217_p7 = pnand %p216_p6, %p210_p3 }
  0x10   :  { %220 = shalt.err (!%p217_p7)
}
  0x11   :  { %s272_s25 = smov 128   ;;  %s273_s26 = smov 8  }
  0x12   :  { %24 = dma.hbm_to_vmem [thread:$0]  %s353_s1, 256, %s19_s16, [#allocation5], %s272_s25, %s272_s25, %s273_s26  }
  0x13   :  { %s274_s29 = smov [#allocation7]   ;;  %s221_s7 = scalar_lea.hbm %s354_s2, 512 }
  0x14   :  { %s30_s30 = sshll.u32 %s274_s29, 4  ;;  %p222_p8 = scmp.ne.s32.totalorder %s354_s2, %s221_s7  ;;  %s31_s30 = int_to_ptr.vmem [resolvable:$true] %s30_s30 }
  0x15   :  { %p225_p9 = scmp.lt.u32.totalorder %s221_s7, %s354_s2 }
  0x17   :  { %p227_p10 = pnand %p225_p9, %p222_p8 }
  0x19   :  { %230 = shalt.err (!%p227_p10)
}
  0x1a   :  { %s231_s12 = scalar_lea.vmem %s31_s30, 512  ;;  %p236_p12 = scmp.lt.s32.totalorder %s31_s30, %s31_s30 }
  0x1b   :  { %p232_p11 = scmp.ne.s32.totalorder %s31_s30, %s231_s12  ;;  %p237_p13 = scmp.lt.s32.totalorder %s231_s12, %s231_s12 }
  0x1d   :  { %p238_p0 = por %p237_p13, %p236_p12 }
  0x1f   :  { %p239_p1 = pnand %p238_p0, %p232_p11 }
  0x21   :  { %242 = shalt.err (!%p239_p1)
}
  0x22   :  { %36 = dma.hbm_to_vmem [thread:$0]  %s354_s2, 512, %s31_s30, [#allocation8], %s272_s25, %s272_s25, %s273_s26  }
  0x23   :  { %265 = dma.done.wait [#allocation5], 256  }
  0x24   :  { %266 = vsyncadd [#allocation5], 4294967040 }
  0x25   :  { %267 = dma.done.wait [#allocation8], 512  }
  0x26   :  { %268 = vsyncadd [#allocation8], 4294966784  ;;  %vm51_vm0 = vcmask 261120   ;;  %v47_v0 = vld [vmem:[#allocation7] sm:$0xff]  ;;  %v48_v1 = vld [vmem:[#allocation7 + $0x8] sm:$0xff]  ;;  %v134_v8 = vstv %s352_s0  ;;  %s275_s17 = smov [#allocation9]  }
  0x27   :  { %v49_v2 = vld [vmem:[#allocation7 + $0x10] sm:$0xff]  ;;  %v186_v3 = vpack.c.bf16 %v48_v1, %v47_v0  ;;  %v50_v4 = vld [vmem:[#allocation7 + $0x18] sm:$0xff]  ;;  %s153_s18 = sshll.u32 %s275_s17, 4  ;;  %s154_s18 = int_to_ptr.vmem [resolvable:$true] %s153_s18 }
  0x28   :  { %v45_v5 = vld [vmem:[#allocation4] sm:$0xff]  ;;  %v190_v6 = vpack.c.bf16 %v50_v4, %v49_v2  ;;  %v46_v7 = vld [vmem:[#allocation4 + $0x8] sm:$0xff]  ;;  %s243_s19 = scalar_lea.vmem %s154_s18, 256  ;;  %p248_p3 = scmp.lt.s32.totalorder %s154_s18, %s154_s18 }
  0x29   :  { %183 = vmatprep.mubr.msk.f32.mxu0 %vm51_vm0, %v45_v5  ;;  %187 = vmatprep.subr.bf16.mxu0 %v186_v3  ;;  %v168_v10 = vld [vmem:[%s355_s3] ss:$0 sm:$0xff]  ;;  %p244_p2 = scmp.ne.s32.totalorder %s154_s18, %s243_s19  ;;  %p249_p4 = scmp.lt.s32.totalorder %s243_s19, %s243_s19 }
  0x2a   :  { %189 = vmatpush3.bf16.msra.mxu0 %v186_v3 }
  0x2b   :  { %191 = vmatprep.subr.bf16.mxu0 %v190_v6  ;;  %p250_p5 = por %p249_p4, %p248_p3 }
  0x2d   :  { %p251_p6 = pnand %p250_p5, %p244_p2 }
  0x2e   :  { %193 = vmatpush3.bf16.msra.mxu0 %v190_v6 }
  0x31   :  { %184 = vmatmul.mubr.msk.f32.vlgmr.msra.gmra.mrb[0].mxu0 %vm51_vm0, %v46_v7 }
 0x104   :  { %v185_v9 = vpop.f32.mrb[0].mxu0 }
 0x105   :  { %v136_v11 = vmul.f32 %v185_v9, %v134_v8  ;;  %v124_v12 = vpop.f32.mrb[1].mxu0 }
 0x106   :  { %v135_v13 = vmul.f32 %v134_v8, %v124_v12 }
 0x107   :  { %v145_v14 = vadd.f32 %v168_v10, %v136_v11 }
 0x108   :  { %v144_v15 = vadd.f32 %v168_v10, %v135_v13 }
 0x109   :  { %147 = vst [vmem:[#allocation9 + $0x8] sm:$0xff] %v145_v14 }
 0x10a   :  { %146 = vst [vmem:[#allocation9] sm:$0xff] %v144_v15 }
 0x10b   :  { %254 = shalt.err (!%p251_p6)
}
 0x10c   :  { %s255_s3 = scalar_lea.hbm %s356_s4, 256 }
 0x10d   :  { %p256_p7 = scmp.ne.s32.totalorder %s356_s4, %s255_s3  ;;  %p259_p8 = scmp.lt.u32.totalorder %s255_s3, %s356_s4 }
 0x10f   :  { %p261_p9 = pnand %p259_p8, %p256_p7 }
 0x111   :  { %264 = shalt.err (!%p261_p9)
}
 0x112   :  { %159 = dma.vmem_to_hbm [thread:$0]  %s154_s18, 256, %s356_s4, [#allocation6], %s272_s25, %s272_s25, %s273_s26  }
 0x113   :  { %269 = dma.done.wait [#allocation6], 256  }
 0x114   :  { %270 = vsyncadd [#allocation6], 4294967040 }
 0x115   :  { %163 = vsyncpa [#allocation5], 1 }
 0x116   :  { %164 = vsyncpa [#allocation8], 1 }
 0x117   :  { %165 = vsyncpa [#allocation6], 1 }

</bundles_post_ra>
